<compile_context>
chip_gen: v7x
topology: tpu7x:2x2x1
jax: 0.10.0
libtpu: 0.0.40
codegen_flags: <defaults>
</compile_context>

<pallas_src>
import numpy as np
import jax
import jax.numpy as jnp
from jax.experimental import pallas as pl
from jax.experimental.pallas import tpu as pltpu

POOL_SIZES = (1, 2, 3, 6)
S_TOTAL = sum(s * s for s in POOL_SIZES)   # 50
S_PAD = 64                                 # sublane-friendly padding of S_TOTAL


# ---------------------------------------------------------------------------
# Static linear operators (host-side glue, computed once).
# ---------------------------------------------------------------------------
def adaptive_pool_matrix(H, W, s):
    """(s*s, H*W) matrix implementing F.adaptive_avg_pool2d(x, (s, s))."""
    M = np.zeros((s, s, H, W), np.float32)
    for i in range(s):
        r0 = (i * H) // s
        r1 = -((-(i + 1) * H) // s)           # ceil((i+1)*H/s)
        for j in range(s):
            c0 = (j * W) // s
            c1 = -((-(j + 1) * W) // s)
            M[i, j, r0:r1, c0:c1] = 1.0 / ((r1 - r0) * (c1 - c0))
    return M.reshape(s * s, H * W)


def _axis_interp_matrix(out_n, in_n):
    """(out_n, in_n) 1-D bilinear matrix, align_corners=True."""
    A = np.zeros((out_n, in_n), np.float32)
    for o in range(out_n):
        if in_n == 1:
            A[o, 0] = 1.0
            continue
        src = 0.0 if out_n == 1 else o * (in_n - 1) / (out_n - 1)
        i0 = int(np.floor(src))
        i1 = min(i0 + 1, in_n - 1)
        f = src - i0
        A[o, i0] += 1.0 - f
        A[o, i1] += f
    return A


def upsample_matrix(H, W, s):
    """(H*W, s*s) matrix for bilinear (s,s)->(H,W), align_corners=True."""
    return np.kron(_axis_interp_matrix(H, s),
                   _axis_interp_matrix(W, s)).astype(np.float32)


# ---------------------------------------------------------------------------
# Tiling / limits helpers.
# ---------------------------------------------------------------------------
def _round_up(v, m):
    return ((v + m - 1) // m) * m


def _choose_hw_tiling(HW, target=512):
    """Pick (hw_tile, HW_pad): hw_tile multiple of 128, >= 256 when possible."""
    target = max(128, (target // 128) * 128)
    if HW <= target:
        tile = _round_up(HW, 128)
        return tile, tile
    return target, _round_up(HW, target)


def _choose_c_tile(C):
    for t in (512, 256, 128, 64, 32, 16, 8):
        if C % t == 0:
            return t
    return C


def _default_vmem_limit():
    # v5e/v6e: 128 MiB physical VMEM (default scoped limit 16/32 MiB is far
    # too conservative); v7x: 64 MiB physical -> leave headroom.
    try:
        cap = int(pltpu.get_tpu_info().vmem_capacity_bytes)
        return max(32 << 20, min(cap - (16 << 20), 96 << 20))
    except Exception:
        return 64 << 20


# ---------------------------------------------------------------------------
# Pass 1: pyramid pooling, NCHW-native.
#   grid = (N, C_in_tiles, HW_tiles); HW_tiles is the reduction ("arbitrary")
#   axis, the first two axes are parallel (keeps both v7x cores busy).
#   pooled^T (c_tile, S_PAD) += x (c_tile, hw_tile) @ P_cat^T (hw_tile, S_PAD)
# ---------------------------------------------------------------------------
def pool_kernel(x_ref, pt_ref, pooled_ref):
    @pl.when(pl.program_id(2) == 0)
    def _():
        pooled_ref[...] = jnp.zeros_like(pooled_ref)

    xb = x_ref[...].astype(jnp.bfloat16)               # in-kernel f32->bf16
    pooled_ref[...] += jnp.dot(xb, pt_ref[...],
                               preferred_element_type=jnp.float32)


# ---------------------------------------------------------------------------
# Pass 2: stream HW tiles, NCHW-native output (no transposes anywhere).
#   out^T (C_out, hw) = Wx^T (C_out, C_in) @ x (C_in, hw)
#                     + g^T (C_out, S_PAD) @ U_cat^T (S_PAD, hw)
#   grid = (N, HW_tiles), both axes "parallel".
# ---------------------------------------------------------------------------
def stream_kernel(x_ref, wx_ref, ut_ref, g_ref, o_ref):
    xb = x_ref[...].astype(jnp.bfloat16)
    acc = jnp.dot(wx_ref[...], xb, preferred_element_type=jnp.float32)
    acc = acc + jnp.dot(g_ref[...], ut_ref[...],
                        preferred_element_type=jnp.float32)
    o_ref[...] = acc.astype(o_ref.dtype)               # bf16, lane-dense store


# ---------------------------------------------------------------------------
# Wrapper.
# ---------------------------------------------------------------------------
def pyramid_forward(x_nchw, kp, *, single_buffer_weights=True):
    """x_nchw: (N, C_in, H, W) f32 -> (N, C_out, H, W) f32."""
    N, C_in, H, W = x_nchw.shape
    HW = H * W
    hw_tile, HW_pad = kp["hw_tile"], kp["hw_pad"]
    C_out = kp["wxT"].shape[0]
    c_tile = _choose_c_tile(C_in)
    n_hw = HW_pad // hw_tile
    n_c = C_in // c_tile
    vmem_limit = _default_vmem_limit()

    # NCHW -> (N, C_in, HW): pure reshape, no extra HBM pass.
    x_flat = x_nchw.reshape(N, C_in, HW)
    if HW_pad != HW:
        x_flat = jnp.pad(x_flat, ((0, 0), (0, 0), (0, HW_pad - HW)))

    # ----------------------- pass 1: pooling sweep -----------------------
    cost1 = pl.CostEstimate(
        flops=int(2 * N * HW_pad * C_in * S_PAD),
        transcendentals=0,
        bytes_accessed=int(x_flat.size * 4 + N * n_c * kp["Pt"].size * 2
                           + N * C_in * S_PAD * 4),
    )
    pooled_t = pl.pallas_call(
        pool_kernel,
        out_shape=jax.ShapeDtypeStruct((N, C_in, S_PAD), jnp.float32),
        grid=(N, n_c, n_hw),
        in_specs=[
            pl.BlockSpec((None, c_tile, hw_tile), lambda n, c, k: (n, c, k)),
            pl.BlockSpec((hw_tile, S_PAD), lambda n, c, k: (k, 0)),
        ],
        out_specs=pl.BlockSpec((None, c_tile, S_PAD), lambda n, c, k: (n, c, 0)),
        compiler_params=pltpu.CompilerParams(
            dimension_semantics=("parallel", "parallel", "arbitrary"),
            vmem_limit_bytes=vmem_limit),
        cost_estimate=cost1,
    )(x_flat, kp["Pt"])

    # ------------- hoisted epilogue (tiny, plain jnp, f32) ---------------
    # Per-branch 1x1 conv + folded BN + ReLU + conv_end1 branch slice on the
    # <=50 pooled rows per batch element.  Keeping this out of the kernel
    # frees VMEM during the HW sweep (v7x) and removes the mask operand.
    pooled = jnp.transpose(pooled_t, (0, 2, 1))          # (N, S_PAD, C_in)
    g_parts, off = [], 0
    for s in POOL_SIZES:
        q = s * s
        h = jax.nn.relu(jnp.einsum("nqc,cm->nqm", pooled[:, off:off + q, :],
                                   kp[f"W{s}"]) + kp[f"b{s}"][None])
        g_parts.append(jnp.einsum("nqm,mo->nqo", h, kp[f"We{s}"]))
        off += q
    g = jnp.concatenate(g_parts, axis=1)                 # (N, S_TOTAL, C_out)
    g = jnp.pad(g, ((0, 0), (0, S_PAD - S_TOTAL), (0, 0)))
    g_t = jnp.transpose(g, (0, 2, 1)).astype(jnp.bfloat16)  # (N, C_out, S_PAD)

    # ----------------------- pass 2: HW streaming ------------------------
    cost2 = pl.CostEstimate(
        flops=int(2 * N * HW_pad * C_out * (C_in + S_PAD)),
        transcendentals=0,
        bytes_accessed=int(x_flat.size * 4 + kp["wxT"].size * 2
                           + N * kp["Ut"].size * 2 + g_t.size * 2
                           + N * C_out * HW_pad * 2),
    )

    def run_pass2(single_buffer):
        # Grid-invariant operands (wxT constant; g_t changes only with batch)
        # don't need double-buffering -> Buffered(1) halves their VMEM.
        extra = {"pipeline_mode": pl.Buffered(1)} if single_buffer else {}
        return pl.pallas_call(
            stream_kernel,
            out_shape=jax.ShapeDtypeStruct((N, C_out, HW_pad), jnp.bfloat16),
            grid=(N, n_hw),
            in_specs=[
                pl.BlockSpec((None, C_in, hw_tile), lambda n, p: (n, 0, p)),
                pl.BlockSpec((C_out, C_in), lambda n, p: (0, 0), **extra),
                pl.BlockSpec((S_PAD, hw_tile), lambda n, p: (0, p)),
                pl.BlockSpec((None, C_out, S_PAD), lambda n, p: (n, 0, 0), **extra),
            ],
            out_specs=pl.BlockSpec((None, C_out, hw_tile),
                                   lambda n, p: (n, 0, p)),
            compiler_params=pltpu.CompilerParams(
                dimension_semantics=("parallel", "parallel"),
                vmem_limit_bytes=vmem_limit),
            cost_estimate=cost2,
        )(x_flat, kp["wxT"], kp["Ut"], g_t)

    if single_buffer_weights:
        try:
            out_t = run_pass2(True)
        except Exception:
            # pipeline_mode=pl.Buffered(1) unsupported on this build -> default.
            out_t = run_pass2(False)
    else:
        out_t = run_pass2(False)

    out = out_t[:, :, :HW].reshape(N, C_out, H, W)
    # Preserve the module's f32 output dtype; skip this cast in a bf16 model.
    return out.astype(jnp.float32)


# ---------------------------------------------------------------------------
# Parameters: BN (eval mode) folded into the branch convs.
# ---------------------------------------------------------------------------
def make_params(key, C_in, mid, C_out, H, W, eps=1e-5):
    params = {}
    n_branches = len(POOL_SIZES)
    keys = jax.random.split(key, n_branches * 6 + 1)

    # conv_end1 weight: (C_out, C_in + 4*mid, 1, 1), no bias.
    w_end = 0.05 * jax.random.normal(keys[-1], (C_out, C_in + n_branches * mid),
                                     jnp.float32)
    params["we_x"] = jnp.transpose(w_end[:, :C_in])               # (C_in, C_out)

    for idx, s in enumerate(POOL_SIZES):
        k0, k1, k2, k3, k4, k5 = keys[6 * idx:6 * idx + 6]
        wc = 0.1 * jax.random.normal(k0, (mid, C_in), jnp.float32)   # 1x1 conv
        bc = 0.1 * jax.random.normal(k1, (mid,), jnp.float32)
        gamma = 1.0 + 0.1 * jax.random.normal(k2, (mid,), jnp.float32)
        beta = 0.1 * jax.random.normal(k3, (mid,), jnp.float32)
        rmean = 0.1 * jax.random.normal(k4, (mid,), jnp.float32)
        rvar = 0.5 + jax.random.uniform(k5, (mid,), jnp.float32)

        scale = gamma / jnp.sqrt(rvar + eps)                  # (mid,)
        w_fold = jnp.transpose(wc) * scale[None, :]           # (C_in, mid)
        b_fold = (bc - rmean) * scale + beta                  # (mid,)

        params[f"P{s}"] = jnp.asarray(adaptive_pool_matrix(H, W, s))
        params[f"W{s}"] = w_fold
        params[f"b{s}"] = b_fold.reshape(1, mid)
        params[f"U{s}"] = jnp.asarray(upsample_matrix(H, W, s))
        c0 = C_in + idx * mid
        params[f"We{s}"] = jnp.transpose(w_end[:, c0:c0 + mid])  # (mid, C_out)
    return params


def prepare_kernel_params(params, H, W, *, hw_tile_target=512):
    """Concatenate/transpose static operators into the kernel operands."""
    HW = H * W
    hw_tile, HW_pad = _choose_hw_tiling(HW, hw_tile_target)

    Pt = np.zeros((HW_pad, S_PAD), np.float32)     # pooling, transposed+padded
    Ut = np.zeros((S_PAD, HW_pad), np.float32)     # upsample, transposed+padded
    off = 0
    for s in POOL_SIZES:
        q = s * s
        Pt[:HW, off:off + q] = np.asarray(params[f"P{s}"]).T
        Ut[off:off + q, :HW] = np.asarray(params[f"U{s}"]).T
        off += q

    kp = dict(
        Pt=jnp.asarray(Pt, jnp.bfloat16),                         # (HW_pad, S_PAD)
        Ut=jnp.asarray(Ut, jnp.bfloat16),                         # (S_PAD, HW_pad)
        wxT=jnp.asarray(np.asarray(params["we_x"]).T, jnp.bfloat16),  # (C_out, C_in)
        hw_tile=hw_tile, hw_pad=HW_pad,
    )
    # Per-branch folded conv/BN params stay f32 (used only in the jnp epilogue).
    for s in POOL_SIZES:
        kp[f"W{s}"] = params[f"W{s}"]
        kp[f"b{s}"] = params[f"b{s}"]
        kp[f"We{s}"] = params[f"We{s}"]
    return kp


# ---------------------------------------------------------------------------
# Pure-JAX f32 reference of the module math (for the correctness check).
# ---------------------------------------------------------------------------
def reference_forward(x_nchw, params):
    N, C_in, H, W = x_nchw.shape
    HW = H * W
    x_flat = jnp.transpose(x_nchw, (0, 2, 3, 1)).reshape(N, HW, C_in)
    acc = jnp.einsum("npc,co->npo", x_flat, params["we_x"])
    for s in POOL_SIZES:
        pooled = jnp.einsum("qp,npc->nqc", params[f"P{s}"], x_flat)
        h = jnp.maximum(jnp.einsum("nqc,cm->nqm", pooled, params[f"W{s}"])
                        + params[f"b{s}"][None], 0.0)
        up = jnp.einsum("pq,nqm->npm", params[f"U{s}"], h)
        acc = acc + jnp.einsum("npm,mo->npo", up, params[f"We{s}"])
    C_out = params["we_x"].shape[1]
    return jnp.transpose(acc.reshape(N, H, W, C_out), (0, 3, 1, 2))


if __name__ == "__main__":
    # Small but lane-dense shapes (channels multiples of 128); HW = 256 so the
    # single HW tile is already >= the 256 minimum recommended tile.
    N, C_in, MID, C_out, H, W = 2, 128, 64, 128, 16, 16

    key = jax.random.PRNGKey(0)
    kx, kw = jax.random.split(key)
    x = jax.random.normal(kx, (N, C_in, H, W), jnp.float32)

    params = make_params(kw, C_in, MID, C_out, H, W)
    kparams = prepare_kernel_params(params, H, W, hw_tile_target=512)

    y = pyramid_forward(x, kparams)
    y = jax.block_until_ready(y)

    y_ref = reference_forward(x, params)
    assert y.shape == (N, C_out, H, W)
    # Kernel uses bf16 matmul operands / bf16 writeback (f32 accumulation);
    # reference is pure f32.
    np.testing.assert_allclose(np.asarray(y), np.asarray(y_ref),
                               rtol=3e-2, atol=3e-2)
    print("KERNEL_OK")
</pallas_src>

<mosaic_0001>
module attributes {stable_mosaic.version = 11 : i64} {
  func.func @pool_kernel(%arg0: i32, %arg1: i32, %arg2: i32, %arg3: memref<1x128x256xf32, #tpu.memory_space<vmem>>, %arg4: memref<256x64xbf16, #tpu.memory_space<vmem>>, %arg5: memref<1x128x64xf32, #tpu.memory_space<vmem>>) attributes {dimension_semantics = [#tpu.dimension_semantics<parallel>, #tpu.dimension_semantics<parallel>, #tpu.dimension_semantics<arbitrary>], iteration_bounds = array<i64: 2, 1, 1>, scalar_prefetch = 0 : i64, scratch_operands = 0 : i64, tpu.core_type = #tpu.core_type<tc>, window_params = [{transform_indices = @transform_0, window_bounds = array<i64: 1, 128, 256>}, {transform_indices = @transform_1, window_bounds = array<i64: 256, 64>}, {transform_indices = @transform_2, window_bounds = array<i64: 1, 128, 64>}]} {
    %c0_i32 = arith.constant 0 : i32
    %0 = arith.cmpi eq, %arg2, %c0_i32 : i32
    %1 = arith.extui %0 : i1 to i32
    %c0_i32_0 = arith.constant 0 : i32
    %2 = arith.cmpi ne, %1, %c0_i32_0 : i32
    scf.if %2 {
      %cst_11 = arith.constant 0.000000e+00 : f32
      %14 = vector.broadcast %cst_11 : f32 to vector<128x64xf32>
      %c0_12 = arith.constant 0 : index
      %c0_13 = arith.constant 0 : index
      %c0_14 = arith.constant 0 : index
      %15 = vector.load %arg5[%c0_12, %c0_13, %c0_14] : memref<1x128x64xf32, #tpu.memory_space<vmem>>, vector<1x128x64xf32>
      %16 = vector.shape_cast %15 : vector<1x128x64xf32> to vector<128x64xf32>
      %17 = vector.shape_cast %14 : vector<128x64xf32> to vector<1x128x64xf32>
      tpu.vector_store %arg5[%c0_12, %c0_13, %c0_14], %17 {strides = array<i32>} : memref<1x128x64xf32, #tpu.memory_space<vmem>>, vector<1x128x64xf32>,
    } else {
    }
    %c0 = arith.constant 0 : index
    %c0_1 = arith.constant 0 : index
    %c0_2 = arith.constant 0 : index
    %3 = vector.load %arg3[%c0, %c0_1, %c0_2] : memref<1x128x256xf32, #tpu.memory_space<vmem>>, vector<1x128x256xf32>
    %4 = vector.shape_cast %3 : vector<1x128x256xf32> to vector<128x256xf32>
    %5 = arith.truncf %4 : vector<128x256xf32> to vector<128x256xbf16>
    %c0_3 = arith.constant 0 : index
    %c0_4 = arith.constant 0 : index
    %c0_5 = arith.constant 0 : index
    %6 = vector.load %arg5[%c0_3, %c0_4, %c0_5] : memref<1x128x64xf32, #tpu.memory_space<vmem>>, vector<1x128x64xf32>
    %7 = vector.shape_cast %6 : vector<1x128x64xf32> to vector<128x64xf32>
    %c0_6 = arith.constant 0 : index
    %c0_7 = arith.constant 0 : index
    %8 = vector.load %arg4[%c0_6, %c0_7] : memref<256x64xbf16, #tpu.memory_space<vmem>>, vector<256x64xbf16>
    %cst = arith.constant dense<0.000000e+00> : vector<128x64xf32>
    %9 = tpu.matmul %5, %8, %cst {dimension_numbers = #tpu.dot_dimension_numbers<[1], [0], [0], [1], [0, 0, 1, 1], [], []>} : vector<128x256xbf16>, vector<256x64xbf16>, vector<128x64xf32> -> vector<128x64xf32>
    %10 = arith.addf %7, %9 : vector<128x64xf32>
    %c0_8 = arith.constant 0 : index
    %c0_9 = arith.constant 0 : index
    %c0_10 = arith.constant 0 : index
    %11 = vector.load %arg5[%c0_8, %c0_9, %c0_10] : memref<1x128x64xf32, #tpu.memory_space<vmem>>, vector<1x128x64xf32>
    %12 = vector.shape_cast %11 : vector<1x128x64xf32> to vector<128x64xf32>
    %13 = vector.shape_cast %10 : vector<128x64xf32> to vector<1x128x64xf32>
    tpu.vector_store %arg5[%c0_8, %c0_9, %c0_10], %13 {strides = array<i32>} : memref<1x128x64xf32, #tpu.memory_space<vmem>>, vector<1x128x64xf32>,
    return
  }
  func.func @transform_0(%arg0: i32, %arg1: i32, %arg2: i32) -> (i32, i32, i32) {
    %c0_i32 = arith.constant 0 : i32
    return %arg0, %arg1, %arg2 : i32, i32, i32
  }
  func.func @transform_1(%arg0: i32, %arg1: i32, %arg2: i32) -> (i32, i32) {
    %c0_i32 = arith.constant 0 : i32
    %c0_i32_0 = arith.constant 0 : i32
    return %arg2, %c0_i32 : i32, i32
  }
  func.func @transform_2(%arg0: i32, %arg1: i32, %arg2: i32) -> (i32, i32, i32) {
    %c0_i32 = arith.constant 0 : i32
    %c0_i32_0 = arith.constant 0 : i32
    return %arg0, %arg1, %c0_i32 : i32, i32, i32
  }
}

</mosaic_0001>

<bundles_post_ra>
// kernel: tpu_custom_call.1
= control target key start
LH: loop header
LB: loop body
LE: loop exit
PB: predicated region body
PF: predicated region fallthrough
CT: control target
= control target key end

     0   :  { %7 = vsyncpa [#allocation3], 0  ;;  %s1402_s0 = inlined_call_operand.hbm [shape: f32[2,128,256], index: 0, kind: input, shape index: {}]   ;;  %s1403_s1 = inlined_call_operand.hbm [shape: bf16[256,64], index: 1, kind: input, shape index: {}]   ;;  %s1404_s2 = inlined_call_operand.hbm [shape: f32[2,128,64], index: 2, kind: output, shape index: {}]  }
   0x1   :  { %9 = vsyncpa [#allocation3 + $0x1], 0 }
   0x2   :  { %10 = vsyncpa [#allocation6], 0 }
   0x3   :  { %11 = vsyncpa [#allocation4], 0 }
   0x4   :  { %13 = vsyncpa [#allocation4 + $0x1], 0  ;;  %s1065_s9 = smov 0   ;;  %s1067_s10 = smov 0  }
   0x5   :  { %s1069_s11 = smov 0   ;;  %s1071_s12 = smov 0  }
   0x6   :  { %s1073_s13 = smov 0   ;;  %s1075_s14 = smov 0  }
   0x7 LB: > { %s683_s15 = sadd.s32 4294967295, %s1038_s14   ;;  %s684_s16 = sadd.s32 4294967294, %s1038_s14   ;;  %s1038_s14 = sphi %s1075_s14, %s19_s14   ;;  %s1034_s13 = sphi %s1073_s13, %s1428_s13   ;;  %s1030_s12 = sphi %s1071_s12, %s1427_s12   ;;  %s1026_s11 = sphi %s1069_s11, %s1426_s11   ;;  %s1022_s10 = sphi %s1067_s10, %s1425_s10   ;;  %s1018_s9 = sphi %s1065_s9, %s1424_s9  }
   0x8   : > { %p62_p0 = scmp.ne.s32.totalorder %s1022_s10, %s1018_s9  ;;  %p1099_p1 = scmp.eq.s32.totalorder %s683_s15, 0 }
   0x9   : > { %p1103_p2 = scmp.eq.s32.totalorder %s683_s15, 1  ;;  %p120_p3 = scmp.eq.s32.totalorder %s684_s16, 1 }
   0xa   : > { %s1409_s17 = scalar_select %p1099_p1, 1, 0 }
   0xb   : > { %s1410_s18 = scalar_select %p1103_p2, 1, 0 }
   0xc   : > { %p1109_p4 = por %p1099_p1, %p62_p0  ;;  %p685_p5 = scmp.ge.s32.totalorder %s1038_s14, 1 }
   0xd   : > { %p1114_p6 = por %p120_p3, %p62_p0  ;;  %p127_p7 = scmp.lt.s32.totalorder %s1038_s14, 3 }
   0xe   : > { %s1411_s19 = scalar_select %p1109_p4, 1, 0 }
   0xf   : > { %s1412_s20 = scalar_select %p1114_p6, 1, 0 }
  0x10   : > { %p1119_p8 = pnand %p685_p5, %p127_p7  ;;  %s1040_s22 = smov [#allocation5]  }
  0x11   : > { %s142_s23 = sshll.u32 %s1040_s22, 4  ;;  %s38_s25 = sadd.s32 1, %s1034_s13  ;;  %s143_s23 = int_to_ptr.vmem [resolvable:$true] %s142_s23 }
  0x12   : > { %s1413_s21 = scalar_select %p1119_p8, 1, 0 }
  0x13   : > { %p806_p9 = pneg %p1119_p8  ;;  %s894_s28 = scalar_lea.hbm %s1403_s1, 2048 }
  0x14   : > { %p895_p12 = scmp.ne.s32.totalorder %s1403_s1, %s894_s28  ;;  %p901_p5 = scmp.lt.u32.totalorder %s894_s28, %s1403_s1 }
  0x15   : > { %p1128_p11 = pnand %p806_p9, %p1099_p1 }
  0x17   : > { %p896_p13 = pneg %p1128_p11 }
  0x19   : > { %p897_p0 = pnand %p896_p13, %p895_p12 }
  0x1b   : > { %p898_p3 = pneg %p897_p0 }
  0x1d   : > { %p903_p7 = pnand %p901_p5, %p898_p3 }
  0x1f   : > { %906 = shalt.err (!%p903_p7)
}
  0x20   : > { %s907_s5 = scalar_lea.vmem %s143_s23, 2048  ;;  %p915_p1 = scmp.lt.s32.totalorder %s143_s23, %s143_s23 }
  0x21   : > { %p908_p9 = scmp.ne.s32.totalorder %s143_s23, %s907_s5  ;;  %p916_p4 = scmp.lt.s32.totalorder %s907_s5, %s907_s5 }
  0x23   : > { %p910_p10 = pnand %p908_p9, %p896_p13  ;;  %p917_p8 = por %p916_p4, %p915_p1 }
  0x25   : > { %p911_p6 = pneg %p910_p10 }
  0x27   : > { %p918_p2 = pnand %p917_p8, %p911_p6 }
  0x29   : > { %921 = shalt.err (!%p918_p2)
}
  0x2a   : > { %s1041_s6 = smov 64   ;;  %s1042_s7 = smov 4  }
  0x2b   : > { %809 = dma.hbm_to_vmem [thread:$0]  (!%p1128_p11), %s1403_s1, 2048, %s143_s23, [#allocation6], %s1041_s6, %s1041_s6, %s1042_s7  }
  0x2c   : > { %p40_p1 = scmp.ge.s32.totalorder %s38_s25, 2  ;;  %s49_s16 = sadd.s32 1, %s1026_s11 }
  0x2d   : > { %p56_p2 = scmp.ne.s32.totalorder %s1026_s11, %s1022_s10  ;;  %p57_p4 = scmp.eq.s32.totalorder %s1038_s14, 0 }
  0x2e   : > { %s1430_s25 = smov (%p40_p1, %s38_s25), 0  ;;  %p1416_p8 = scmp.ne.s32.totalorder %s1410_s18, 0 }
  0x2f   : > { %p1155_p6 = por %p57_p4, %p56_p2  ;;  %s42_s24 = ssub.s32 %s1034_s13, %s1430_s25 }
  0x30   : > { %p1161_p10 = por %p1416_p8, %p56_p2  ;;  %p819_p12 = scmp.lt.s32.totalorder %s1038_s14, 2 }
  0x31   : > { %p47_p11 = scmp.eq.s32.totalorder %s42_s24, 0  ;;  %s156_s23 = sand.u32 1, %s1026_s11  }
  0x32   : > { %s688_s27 = sshll.u32 %s156_s23, 8  ;;  %s716_s29 = sshll.u32 %s1034_s13, 12 }
  0x33   : > { %s1170_s28 = scalar_select %p47_p11, %s1026_s11, %s49_s16  }
  0x34   : > { %s1176_s4 = scalar_lea.hbm %s1402_s0, %s716_s29  ;;  %s160_s18 = scalar_lea.vmem [#allocation2], %s688_s27 }
  0x35   : > { %s172_s5 = sshll.u32 %s160_s18, 4  ;;  %p1182_p13 = pnand %p819_p12, %p1155_p6  ;;  %s1178_s5 = int_to_ptr.vmem [resolvable:$true] %s172_s5 }
  0x36   : > { %s1186_s7 = scalar_lea.sflag [#allocation3], %s156_s23  ;;  %s922_s8 = scalar_lea.hbm %s1176_s4, 4096 }
  0x37   : > { %p923_p0 = scmp.ne.s32.totalorder %s1176_s4, %s922_s8  ;;  %p924_p3 = pneg %p1182_p13 }
  0x38   : > { %s927_s22 = scalar_lea.hbm %s1402_s0, 8192  ;;  %p928_p9 = scmp.lt.u32.totalorder %s1176_s4, %s1402_s0 }
  0x39   : > { %p925_p5 = pnand %p924_p3, %p923_p0  ;;  %p929_p1 = scmp.lt.u32.totalorder %s927_s22, %s922_s8 }
  0x3a   : > { %p931_p4 = scmp.lt.u32.totalorder %s922_s8, %s1176_s4 }
  0x3b   : > { %p926_p7 = pneg %p925_p5  ;;  %p930_p2 = por %p929_p1, %p928_p9 }
  0x3d   : > { %p932_p6 = por %p931_p4, %p930_p2 }
  0x3f   : > { %p933_p8 = pnand %p932_p6, %p926_p7 }
  0x41   : > { %936 = shalt.err (!%p933_p8)
}
  0x42   : > { %s937_s23 = scalar_lea.vmem %s1178_s5, 4096  ;;  %s1043_s29 = smov [#allocation2]  }
  0x43   : > { %p938_p12 = scmp.ne.s32.totalorder %s1178_s5, %s937_s23  ;;  %s942_s30 = sshll.u32 %s1043_s29, 4  ;;  %s943_s30 = int_to_ptr.vmem [resolvable:$false] %s942_s30 }
  0x44   : > { %s944_s3 = scalar_lea.vmem %s943_s30, 8192  ;;  %p945_p5 = scmp.lt.s32.totalorder %s1178_s5, %s943_s30 }
  0x45   : > { %p940_p11 = pnand %p938_p12, %p924_p3  ;;  %p946_p9 = scmp.lt.s32.totalorder %s944_s3, %s937_s23 }
  0x47   : > { %p941_p0 = pneg %p940_p11  ;;  %p947_p1 = por %p946_p9, %p945_p5 }
  0x49   : > { %p948_p2 = pnand %p947_p1, %p941_p0 }
  0x4b   : > { %951 = shalt.err (!%p948_p2)
}
  0x4c   : > { %s1044_s18 = smov 256   ;;  %s1045_s8 = smov 16  }
  0x4d   : > { %813 = dma.hbm_to_vmem [thread:$0]  (!%p1182_p13), %s1176_s4, 4096, %s1178_s5, %s1186_s7, %s1044_s18, %s1044_s18, %s1045_s8  }
  0x4e   : > { %p1419_p3 = scmp.ne.s32.totalorder %s1413_s21, 0 }
  0x4f   : > { %s1217_s15 = sand.u32 (!%p1419_p3), 1, %s1022_s10   ;;  %p1420_p7 = scmp.ne.s32.totalorder (!%p1419_p3), %s1411_s19, 0 }
  0x50   : > { %184 = sbr.rel (%p1419_p3) target bundleno = 382 (0x17e), region = 28  ;;  %s692_s16 = sshll.u32 (!%p1419_p3), %s1217_s15, 8 }
  0x51   : > { %s187_s22 = scalar_lea.sflag (!%p1419_p3), [#allocation3], %s1217_s15  ;;  %s1221_s24 = scalar_lea.vmem (!%p1419_p3), [#allocation2], %s692_s16 }
  0x57   : > { %1005 = dma.done.wait (%p1420_p7), %s187_s22, 4096  }
  0x58   : > { %1007 = vsyncadd (%p1420_p7), %s187_s22, 4294963200  ;;  %p1421_p13 = scmp.ne.s32.totalorder %s1409_s17, 0 }
  0x5a   : > { %1009 = dma.done.wait (%p1421_p13), [#allocation6], 2048  }
  0x5b   : > { %1011 = vsyncadd (%p1421_p13), [#allocation6], 4294965248  ;;  %v878_v0 = vld [vmem:[#allocation5 + $0x40] sm:$0xff]   ;;  %v880_v2 = vld [vmem:[#allocation5 + $0x48] sm:$0xff]   ;;  %s694_s17 = sshll.u32 %s1217_s15, 7  ;;  %vm224_vm0 = vcmask 523264  }
  0x5c   : > { %v879_v1 = vld [vmem:[#allocation5] sm:$0xff]   ;;  %718 = vmatprep.subr.bf16.mxu0 %v878_v0  ;;  %782 = vmatprep.subr.bf16.mxu1 %v878_v0  ;;  %v881_v3 = vld [vmem:[#allocation5 + $0x8] sm:$0xff]   ;;  %v882_v4 = vld [vmem:[#allocation5 + $0x50] sm:$0xff]   ;;  %s1264_s19 = scalar_lea.vmem [#allocation7], %s694_s17  ;;  %v1046_v0 = vmov 0.0   ;;  %s717_s21 = sshll.u32 %s1030_s12, 11 }
  0x5d   : > { %719 = vmatpush3.bf16.msra.mxu0 %v879_v1  ;;  %790 = vmatpush3.bf16.msra.mxu1 %v879_v1  ;;  %v883_v5 = vld [vmem:[#allocation5 + $0x10] sm:$0xff]   ;;  %v884_v6 = vld [vmem:[#allocation5 + $0x58] sm:$0xff]   ;;  %v886_v8 = vld [vmem:[#allocation5 + $0x60] sm:$0xff]   ;;  %225 = vst.msk [vmem:[%s1264_s19] sm:$0xff] %vm224_vm0, %v1046_v0  ;;  %s579_s4 = sshll.u32 %s1264_s19, 4  ;;  %s1343_s7 = scalar_lea.hbm %s1404_s2, %s717_s21  ;;  %s1345_s4 = int_to_ptr.vmem [resolvable:$true] %s579_s4 }
  0x5e   : > { %720 = vmatprep.subr.bf16.mxu0 %v880_v2  ;;  %783 = vmatprep.subr.bf16.mxu1 %v880_v2  ;;  %v885_v7 = vld [vmem:[#allocation5 + $0x18] sm:$0xff]   ;;  %v887_v9 = vld [vmem:[#allocation5 + $0x20] sm:$0xff]   ;;  %v888_v10 = vld [vmem:[#allocation5 + $0x68] sm:$0xff]   ;;  %226 = vst.msk [vmem:[%s1264_s19 + $0x8] sm:$0xff] %vm224_vm0, %v1046_v0  ;;  %s564_s12 = scalar_lea.sflag [#allocation4], %s1217_s15  ;;  %s952_s27 = scalar_lea.vmem %s1345_s4, 2048 }
  0x5f   : > { %v242_v11 = vld [vmem:[%s1221_s24 + $0x8] sm:$0xff]  ;;  %v244_v12 = vld [vmem:[%s1221_s24 + $0x18] sm:$0xff]  ;;  %v890_v18 = vld [vmem:[#allocation5 + $0x70] sm:$0xff]   ;;  %227 = vst.msk [vmem:[%s1264_s19 + $0x10] sm:$0xff] %vm224_vm0, %v1046_v0  ;;  %p953_p4 = scmp.ne.s32.totalorder %s1345_s4, %s952_s27  ;;  %s1047_s23 = smov [#allocation7]  }
  0x60   : > { %v258_v13 = vld [vmem:[%s1221_s24 + $0x88] sm:$0xff]  ;;  %v274_v14 = vpack.c.bf16 %v244_v12, %v242_v11  ;;  %v260_v15 = vld [vmem:[%s1221_s24 + $0x98] sm:$0xff]  ;;  %v891_v19 = vld [vmem:[#allocation5 + $0x30] sm:$0xff]   ;;  %228 = vst.msk [vmem:[%s1264_s19 + $0x18] sm:$0xff] %vm224_vm0, %v1046_v0  ;;  %s956_s29 = sshll.u32 %s1047_s23, 4  ;;  %s957_s29 = int_to_ptr.vmem [resolvable:$false] %s956_s29 }
  0x61   : > { %721 = vmatpush3.bf16.msra.mxu0 %v881_v3  ;;  %791 = vmatpush3.bf16.msra.mxu1 %v881_v3  ;;  %v282_v16 = vpack.c.bf16 %v260_v15, %v258_v13  ;;  %v889_v17 = vld [vmem:[#allocation5 + $0x28] sm:$0xff]   ;;  %v892_v20 = vld [vmem:[#allocation5 + $0x78] sm:$0xff]   ;;  %v241_v22 = vld [vmem:[%s1221_s24] sm:$0xff]  ;;  %229 = vst.msk [vmem:[%s1264_s19 + $0x20] sm:$0xff] %vm224_vm0, %v1046_v0  ;;  %p954_p6 = pnand %p953_p4, %p1161_p10  ;;  %s958_s30 = scalar_lea.vmem %s957_s29, 4096 }
  0x62   : > { %722 = vmatprep.subr.bf16.mxu0 %v882_v4  ;;  %784 = vmatprep.subr.bf16.mxu1 %v882_v4  ;;  %v893_v21 = vld [vmem:[#allocation5 + $0x38] sm:$0xff]   ;;  %v243_v23 = vld [vmem:[%s1221_s24 + $0x10] sm:$0xff]  ;;  %v257_v24 = vld [vmem:[%s1221_s24 + $0x80] sm:$0xff]  ;;  %230 = vst.msk [vmem:[%s1264_s19 + $0x28] sm:$0xff] %vm224_vm0, %v1046_v0  ;;  %p959_p12 = scmp.lt.s32.totalorder %s1345_s4, %s957_s29  ;;  %p960_p11 = scmp.lt.s32.totalorder %s958_s30, %s952_s27 }
  0x63   : > { %465 = vmatprep.mubr.bf16.mxu0 %v274_v14  ;;  %497 = vmatprep.mubr.bf16.mxu1 %v282_v16  ;;  %v259_v25 = vld [vmem:[%s1221_s24 + $0x90] sm:$0xff]  ;;  %v246_v26 = vld [vmem:[%s1221_s24 + $0x28] sm:$0xff]  ;;  %v248_v27 = vld [vmem:[%s1221_s24 + $0x38] sm:$0xff]  ;;  %v273_v30 = vpack.c.bf16 %v243_v23, %v241_v22  ;;  %231 = vst.msk [vmem:[%s1264_s19 + $0x30] sm:$0xff] %vm224_vm0, %v1046_v0  ;;  %p955_p8 = pneg %p954_p6 }
  0x64   : > { %v262_v28 = vld [vmem:[%s1221_s24 + $0xa8] sm:$0xff]  ;;  %v264_v29 = vld [vmem:[%s1221_s24 + $0xb8] sm:$0xff]  ;;  %v281_v31 = vpack.c.bf16 %v259_v25, %v257_v24  ;;  %v276_v32 = vpack.c.bf16 %v248_v27, %v246_v26  ;;  %v245_v34 = vld [vmem:[%s1221_s24 + $0x20] sm:$0xff]  ;;  %232 = vst.msk [vmem:[%s1264_s19 + $0x38] sm:$0xff] %vm224_vm0, %v1046_v0  ;;  %p961_p0 = por %p960_p11, %p959_p12 }
  0x65   : > { %723 = vmatpush3.bf16.msra.mxu0 %v883_v5  ;;  %792 = vmatpush3.bf16.msra.mxu1 %v883_v5  ;;  %v284_v33 = vpack.c.bf16 %v264_v29, %v262_v28  ;;  %v247_v35 = vld [vmem:[%s1221_s24 + $0x30] sm:$0xff]  ;;  %v261_v36 = vld [vmem:[%s1221_s24 + $0xa0] sm:$0xff]  ;;  %v250_v38 = vld [vmem:[%s1221_s24 + $0x48] sm:$0xff]  ;;  %233 = vst.msk [vmem:[%s1264_s19 + $0x40] sm:$0xff] %vm224_vm0, %v1046_v0 }
  0x66   : > { %724 = vmatprep.subr.bf16.mxu0 %v884_v6  ;;  %785 = vmatprep.subr.bf16.mxu1 %v884_v6  ;;  %v263_v37 = vld [vmem:[%s1221_s24 + $0xb0] sm:$0xff]  ;;  %v252_v39 = vld [vmem:[%s1221_s24 + $0x58] sm:$0xff]  ;;  %v266_v40 = vld [vmem:[%s1221_s24 + $0xc8] sm:$0xff]  ;;  %v275_v42 = vpack.c.bf16 %v247_v35, %v245_v34  ;;  %234 = vst.msk [vmem:[%s1264_s19 + $0x48] sm:$0xff] %vm224_vm0, %v1046_v0  ;;  %p962_p5 = pnand %p961_p0, %p955_p8 }
  0x67   : > { %v268_v41 = vld [vmem:[%s1221_s24 + $0xd8] sm:$0xff]  ;;  %v283_v43 = vpack.c.bf16 %v263_v37, %v261_v36  ;;  %v278_v44 = vpack.c.bf16 %v252_v39, %v250_v38  ;;  %v249_v46 = vld [vmem:[%s1221_s24 + $0x40] sm:$0xff]  ;;  %v251_v47 = vld [vmem:[%s1221_s24 + $0x50] sm:$0xff]  ;;  %235 = vst.msk [vmem:[%s1264_s19 + $0x50] sm:$0xff] %vm224_vm0, %v1046_v0 }
  0x68   : > { %v286_v45 = vpack.c.bf16 %v268_v41, %v266_v40  ;;  %v265_v48 = vld [vmem:[%s1221_s24 + $0xc0] sm:$0xff]  ;;  %v267_v49 = vld [vmem:[%s1221_s24 + $0xd0] sm:$0xff]  ;;  %v254_v50 = vld [vmem:[%s1221_s24 + $0x68] sm:$0xff]  ;;  %v277_v54 = vpack.c.bf16 %v251_v47, %v249_v46  ;;  %236 = vst.msk [vmem:[%s1264_s19 + $0x58] sm:$0xff] %vm224_vm0, %v1046_v0 }
  0x69   : > { %725 = vmatpush3.bf16.msra.mxu0 %v885_v7  ;;  %793 = vmatpush3.bf16.msra.mxu1 %v885_v7  ;;  %v256_v51 = vld [vmem:[%s1221_s24 + $0x78] sm:$0xff]  ;;  %v270_v52 = vld [vmem:[%s1221_s24 + $0xe8] sm:$0xff]  ;;  %v285_v55 = vpack.c.bf16 %v267_v49, %v265_v48  ;;  %v253_v58 = vld [vmem:[%s1221_s24 + $0x60] sm:$0xff]  ;;  %237 = vst.msk [vmem:[%s1264_s19 + $0x60] sm:$0xff] %vm224_vm0, %v1046_v0 }
  0x6a   : > { %726 = vmatprep.subr.bf16.mxu0 %v886_v8  ;;  %786 = vmatprep.subr.bf16.mxu1 %v886_v8  ;;  %v272_v53 = vld [vmem:[%s1221_s24 + $0xf8] sm:$0xff]  ;;  %v280_v56 = vpack.c.bf16 %v256_v51, %v254_v50  ;;  %v255_v59 = vld [vmem:[%s1221_s24 + $0x70] sm:$0xff]  ;;  %v269_v60 = vld [vmem:[%s1221_s24 + $0xe0] sm:$0xff]  ;;  %238 = vst.msk [vmem:[%s1264_s19 + $0x68] sm:$0xff] %vm224_vm0, %v1046_v0 }
  0x6b   : > { %v288_v57 = vpack.c.bf16 %v272_v53, %v270_v52  ;;  %v271_v61 = vld [vmem:[%s1221_s24 + $0xf0] sm:$0xff]  ;;  %v279_v62 = vpack.c.bf16 %v255_v59, %v253_v58  ;;  %239 = vst.msk [vmem:[%s1264_s19 + $0x70] sm:$0xff] %vm224_vm0, %v1046_v0  ;;  %240 = vst.msk [vmem:[%s1264_s19 + $0x78] sm:$0xff] %vm224_vm0, %v1046_v0  ;;  %v289_v3 = vld [vmem:[%s1264_s19] sm:$0xff] }
  0x6c   : > { %v287_v63 = vpack.c.bf16 %v271_v61, %v269_v60  ;;  %v297_v5 = vld [vmem:[%s1264_s19 + $0x40] sm:$0xff]  ;;  %v290_v11 = vld [vmem:[%s1264_s19 + $0x8] sm:$0xff]  ;;  %v291_v23 = vld [vmem:[%s1264_s19 + $0x10] sm:$0xff] }
  0x6d   : > { %727 = vmatpush3.bf16.msra.mxu0 %v887_v9  ;;  %794 = vmatpush3.bf16.msra.mxu1 %v887_v9  ;;  %v298_v13 = vld [vmem:[%s1264_s19 + $0x48] sm:$0xff] }
  0x6e   : > { %728 = vmatprep.subr.bf16.mxu0 %v888_v10  ;;  %787 = vmatprep.subr.bf16.mxu1 %v888_v10  ;;  %v299_v25 = vld [vmem:[%s1264_s19 + $0x50] sm:$0xff]  ;;  %v294_v51 = vld [vmem:[%s1264_s19 + $0x28] sm:$0xff] }
  0x71   : > { %729 = vmatpush3.bf16.msra.mxu0 %v889_v17  ;;  %795 = vmatpush3.bf16.msra.mxu1 %v889_v17  ;;  %v302_v53 = vld [vmem:[%s1264_s19 + $0x68] sm:$0xff] }
  0x72   : > { %730 = vmatprep.subr.bf16.mxu0 %v890_v18  ;;  %788 = vmatprep.subr.bf16.mxu1 %v890_v18 }
  0x75   : > { %731 = vmatpush3.bf16.msra.mxu0 %v891_v19  ;;  %796 = vmatpush3.bf16.msra.mxu1 %v891_v19 }
  0x76   : > { %732 = vmatprep.subr.bf16.mxu0 %v892_v20  ;;  %789 = vmatprep.subr.bf16.mxu1 %v892_v20 }
  0x79   : > { %733 = vmatpush3.bf16.msra.mxu0 %v893_v21  ;;  %797 = vmatpush3.bf16.msra.mxu1 %v893_v21 }
  0x7c   : > { %466 = vmatmul.mubr.bf16.vlgmr.msra.gmra.mrb[0].mxu0 %v273_v30  ;;  %498 = vmatmul.mubr.bf16.vlgmr.msra.gmra.mrb[0].mxu1 %v281_v31  ;;  %v292_v31 = vld [vmem:[%s1264_s19 + $0x18] sm:$0xff] }
  0x7d   : > { %473 = vmatprep.mubr.bf16.mxu0 %v276_v32  ;;  %505 = vmatprep.mubr.bf16.mxu1 %v284_v33  ;;  %v300_v33 = vld [vmem:[%s1264_s19 + $0x58] sm:$0xff] }
  0x84   : > { %474 = vmatmul.mubr.bf16.gmra.mrb[4].mxu0 %v275_v42  ;;  %506 = vmatmul.mubr.bf16.gmra.mrb[4].mxu1 %v283_v43  ;;  %v293_v43 = vld [vmem:[%s1264_s19 + $0x20] sm:$0xff] }
  0x85   : > { %481 = vmatprep.mubr.bf16.mxu0 %v278_v44  ;;  %513 = vmatprep.mubr.bf16.mxu1 %v286_v45  ;;  %v301_v45 = vld [vmem:[%s1264_s19 + $0x60] sm:$0xff] }
  0x8c   : > { %482 = vmatmul.mubr.bf16.gmra.mrb[8].mxu0 %v277_v54  ;;  %514 = vmatmul.mubr.bf16.gmra.mrb[8].mxu1 %v285_v55 }
  0x8d   : > { %489 = vmatprep.mubr.bf16.mxu0 %v280_v56  ;;  %521 = vmatprep.mubr.bf16.mxu1 %v288_v57 }
  0x94   : > { %490 = vmatmul.mubr.bf16.gmra.mrb[12].mxu0 %v279_v62  ;;  %522 = vmatmul.mubr.bf16.gmra.mrb[12].mxu1 %v287_v63  ;;  %v295_v63 = vld [vmem:[%s1264_s19 + $0x30] sm:$0xff] }
 0x14f   : > { %v734_v1 = vpop.f32.mrb[0].mxu0  ;;  %v758_v2 = vpop.f32.mrb[0].mxu1 }
 0x150   : > { %v735_v4 = vpop.f32.mrb[1].mxu0  ;;  %v759_v6 = vpop.f32.mrb[1].mxu1 }
 0x151   : > { %v736_v7 = vadd.f32 %v735_v4, %v734_v1  ;;  %v760_v8 = vadd.f32 %v759_v6, %v758_v2  ;;  %v737_v9 = vpop.f32.mrb[2].mxu0  ;;  %v761_v10 = vpop.f32.mrb[2].mxu1  ;;  %v303_v1 = vld [vmem:[%s1264_s19 + $0x70] sm:$0xff] }
 0x152   : > { %v738_v12 = vpop.f32.mrb[3].mxu0  ;;  %v762_v14 = vpop.f32.mrb[3].mxu1 }
 0x153   : > { %v530_v15 = vadd.f32 %v736_v7, %v289_v3  ;;  %v538_v16 = vadd.f32 %v760_v8, %v297_v5  ;;  %v739_v17 = vadd.f32 %v738_v12, %v737_v9  ;;  %v763_v18 = vadd.f32 %v762_v14, %v761_v10  ;;  %v296_v7 = vld [vmem:[%s1264_s19 + $0x38] sm:$0xff] }
 0x154   : > { %v304_v9 = vld [vmem:[%s1264_s19 + $0x78] sm:$0xff] }
 0x155   : > { %547 = vst.msk [vmem:[%s1264_s19] sm:$0xff] %vm224_vm0, %v530_v15  ;;  %555 = vst.msk [vmem:[%s1264_s19 + $0x40] sm:$0xff] %vm224_vm0, %v538_v16  ;;  %v531_v19 = vadd.f32 %v739_v17, %v290_v11  ;;  %v539_v20 = vadd.f32 %v763_v18, %v298_v13 }
 0x157   : > { %548 = vst.msk [vmem:[%s1264_s19 + $0x8] sm:$0xff] %vm224_vm0, %v531_v19  ;;  %556 = vst.msk [vmem:[%s1264_s19 + $0x48] sm:$0xff] %vm224_vm0, %v539_v20  ;;  %v740_v21 = vpop.f32.mrb[4].mxu0  ;;  %v764_v22 = vpop.f32.mrb[4].mxu1 }
 0x158   : > { %v741_v24 = vpop.f32.mrb[5].mxu0  ;;  %v765_v26 = vpop.f32.mrb[5].mxu1 }
 0x159   : > { %v742_v27 = vadd.f32 %v741_v24, %v740_v21  ;;  %v766_v28 = vadd.f32 %v765_v26, %v764_v22  ;;  %v743_v29 = vpop.f32.mrb[6].mxu0  ;;  %v767_v30 = vpop.f32.mrb[6].mxu1 }
 0x15a   : > { %v744_v32 = vpop.f32.mrb[7].mxu0  ;;  %v768_v34 = vpop.f32.mrb[7].mxu1 }
 0x15b   : > { %v532_v35 = vadd.f32 %v742_v27, %v291_v23  ;;  %v540_v36 = vadd.f32 %v766_v28, %v299_v25  ;;  %v745_v37 = vadd.f32 %v744_v32, %v743_v29  ;;  %v769_v38 = vadd.f32 %v768_v34, %v767_v30 }
 0x15d   : > { %549 = vst.msk [vmem:[%s1264_s19 + $0x10] sm:$0xff] %vm224_vm0, %v532_v35  ;;  %557 = vst.msk [vmem:[%s1264_s19 + $0x50] sm:$0xff] %vm224_vm0, %v540_v36  ;;  %v533_v39 = vadd.f32 %v745_v37, %v292_v31  ;;  %v541_v40 = vadd.f32 %v769_v38, %v300_v33 }
 0x15f   : > { %550 = vst.msk [vmem:[%s1264_s19 + $0x18] sm:$0xff] %vm224_vm0, %v533_v39  ;;  %558 = vst.msk [vmem:[%s1264_s19 + $0x58] sm:$0xff] %vm224_vm0, %v541_v40  ;;  %v746_v41 = vpop.f32.mrb[8].mxu0  ;;  %v770_v42 = vpop.f32.mrb[8].mxu1 }
 0x160   : > { %v747_v44 = vpop.f32.mrb[9].mxu0  ;;  %v771_v46 = vpop.f32.mrb[9].mxu1 }
 0x161   : > { %v748_v47 = vadd.f32 %v747_v44, %v746_v41  ;;  %v772_v48 = vadd.f32 %v771_v46, %v770_v42  ;;  %v749_v49 = vpop.f32.mrb[10].mxu0  ;;  %v773_v50 = vpop.f32.mrb[10].mxu1 }
 0x162   : > { %v750_v52 = vpop.f32.mrb[11].mxu0  ;;  %v774_v54 = vpop.f32.mrb[11].mxu1 }
 0x163   : > { %v534_v55 = vadd.f32 %v748_v47, %v293_v43  ;;  %v542_v56 = vadd.f32 %v772_v48, %v301_v45  ;;  %v751_v57 = vadd.f32 %v750_v52, %v749_v49  ;;  %v775_v58 = vadd.f32 %v774_v54, %v773_v50 }
 0x165   : > { %551 = vst.msk [vmem:[%s1264_s19 + $0x20] sm:$0xff] %vm224_vm0, %v534_v55  ;;  %559 = vst.msk [vmem:[%s1264_s19 + $0x60] sm:$0xff] %vm224_vm0, %v542_v56  ;;  %v535_v59 = vadd.f32 %v751_v57, %v294_v51  ;;  %v543_v60 = vadd.f32 %v775_v58, %v302_v53 }
 0x167   : > { %552 = vst.msk [vmem:[%s1264_s19 + $0x28] sm:$0xff] %vm224_vm0, %v535_v59  ;;  %560 = vst.msk [vmem:[%s1264_s19 + $0x68] sm:$0xff] %vm224_vm0, %v543_v60  ;;  %v752_v61 = vpop.f32.mrb[12].mxu0  ;;  %v776_v62 = vpop.f32.mrb[12].mxu1 }
 0x168   : > { %v753_v0 = vpop.f32.mrb[13].mxu0  ;;  %v777_v2 = vpop.f32.mrb[13].mxu1 }
 0x169   : > { %v754_v3 = vadd.f32 %v753_v0, %v752_v61  ;;  %v778_v4 = vadd.f32 %v777_v2, %v776_v62  ;;  %v755_v5 = vpop.f32.mrb[14].mxu0  ;;  %v779_v6 = vpop.f32.mrb[14].mxu1 }
 0x16a   : > { %v756_v8 = vpop.f32.mrb[15].mxu0  ;;  %v780_v10 = vpop.f32.mrb[15].mxu1 }
 0x16b   : > { %v536_v11 = vadd.f32 %v754_v3, %v295_v63  ;;  %v544_v12 = vadd.f32 %v778_v4, %v303_v1  ;;  %v757_v13 = vadd.f32 %v756_v8, %v755_v5  ;;  %v781_v14 = vadd.f32 %v780_v10, %v779_v6 }
 0x16d   : > { %553 = vst.msk [vmem:[%s1264_s19 + $0x30] sm:$0xff] %vm224_vm0, %v536_v11  ;;  %561 = vst.msk [vmem:[%s1264_s19 + $0x70] sm:$0xff] %vm224_vm0, %v544_v12  ;;  %v537_v15 = vadd.f32 %v757_v13, %v296_v7  ;;  %v545_v16 = vadd.f32 %v781_v14, %v304_v9 }
 0x16f   : > { %554 = vst.msk [vmem:[%s1264_s19 + $0x38] sm:$0xff] %vm224_vm0, %v537_v15  ;;  %562 = vst.msk [vmem:[%s1264_s19 + $0x78] sm:$0xff] %vm224_vm0, %v545_v16 }
 0x170   : > { %965 = shalt.err (!%p962_p5)
}
 0x171   : > { %s966_s3 = scalar_lea.hbm %s1343_s7, 2048  ;;  %s970_s16 = scalar_lea.hbm %s1404_s2, 4096 }
 0x172   : > { %p967_p9 = scmp.ne.s32.totalorder %s1343_s7, %s966_s3  ;;  %p971_p3 = scmp.lt.u32.totalorder %s1343_s7, %s1404_s2 }
 0x173   : > { %p972_p7 = scmp.lt.u32.totalorder %s970_s16, %s966_s3  ;;  %p974_p4 = scmp.lt.u32.totalorder %s966_s3, %s1343_s7 }
 0x174   : > { %p968_p1 = pnand %p967_p9, %p1161_p10 }
 0x175   : > { %p973_p13 = por %p972_p7, %p971_p3 }
 0x176   : > { %p969_p2 = pneg %p968_p1 }
 0x177   : > { %p975_p6 = por %p974_p4, %p973_p13 }
 0x179   : > { %p976_p8 = pnand %p975_p6, %p969_p2 }
 0x17b   : > { %979 = shalt.err (!%p976_p8)
}
 0x17c   : > { %s1048_s17 = smov 128   ;;  %s1049_s19 = smov 8  }
 0x17d   : > { %804 = dma.vmem_to_hbm [thread:$0]  (%p1161_p10), %s1345_s4, 2048, %s1343_s7, %s564_s12, %s1048_s17, %s1048_s17, %s1049_s19  }
 0x17e PF: > { %s594_s21 = sand.u32 1, %s1018_s9   ;;  %p1422_p12 = scmp.ne.s32.totalorder %s1412_s20, 0 }
 0x17f   : > { %p1423_p11 = scmp.ge.s32.totalorder %s1038_s14, 2  ;;  %s595_s5 = scalar_lea.sflag [#allocation4], %s594_s21 }
 0x181   : > { %p815_p0 = pnand %p1423_p11, %p1422_p12 }
 0x183   : > { %1013 = dma.done.wait (!%p815_p0), %s595_s5, 2048  }
 0x184   : > { %1015 = vsyncadd (!%p815_p0), %s595_s5, 4294965248  ;;  %s19_s14 = sadd.s32 1, %s1038_s14   ;;  %s1424_s9 = smov %s1022_s10 }
 0x185   : > { %p16_p5 = scmp.ge.s32.totalorder %s19_s14, 4   ;;  %s1425_s10 = smov %s1026_s11 }
 0x186   : > { %s1426_s11 = smov %s1170_s28  ;;  %s1427_s12 = smov %s1034_s13 }
 0x187   : > { %s1428_s13 = smov %s1430_s25  ;;  %18 = sbr.rel (!%p16_p5) target bundleno = 7 (0x7), region = 82 }
 0x18e   :  { %600 = vsyncpa [#allocation3], 1 }
 0x18f   :  { %602 = vsyncpa [#allocation3 + $0x1], 1 }
 0x190   :  { %603 = vsyncpa [#allocation6], 1 }
 0x191   :  { %604 = vsyncpa [#allocation4], 1 }
 0x192   :  { %606 = vsyncpa [#allocation4 + $0x1], 1 }

</bundles_post_ra>
